<compile_context>
chip_gen: v7x
topology: tpu7x:2x2x1
jax: 0.10.0
libtpu: 0.0.40
codegen_flags: <defaults>
</compile_context>

<pallas_src>
import functools

import jax
import jax.numpy as jnp
from jax.experimental import pallas as pl
from jax.experimental.pallas import tpu as pltpu

_LANES = 128
_SUBLANES = 8


def _round_up(x, m):
    return (x + m - 1) // m * m


def pack_dynamics_encoder_params(weights, biases):
    """Pack per-layer (in, out) weights and (out,) biases into one zero-padded
    (rows, 128) f32 block.

    Layer 0's weight occupies rows [0, round_up(param_dim, 8)) (all 128 lanes,
    zero-padded).  Every subsequent layer's weight occupies a full 128-row
    block so the in-kernel activations can stay at (tm, 128) and every weight
    slice is a clean, fully aligned (rows, 128) tile.  Biases are one row per
    layer at the end.  Zero padding keeps the math exact (relu(0)=0, and the
    padded lanes of the final pre-activation are simply dropped).
    """
    n_layers = len(weights)
    assert len(biases) == n_layers and n_layers >= 1

    param_dim = int(weights[0].shape[0])
    first_din = _round_up(param_dim, _SUBLANES)

    row_offsets = [0]
    r = first_din
    for w in weights[1:]:
        assert w.shape[0] <= _LANES, "hidden width must fit in 128 lanes"
        row_offsets.append(r)
        r += _LANES
    for w in weights:
        assert w.shape[1] <= _LANES, "layer output width must fit in 128 lanes"

    bias_row0 = r
    n_rows = _round_up(bias_row0 + n_layers, _SUBLANES)

    p = jnp.zeros((n_rows, _LANES), jnp.float32)
    for i, (w, b) in enumerate(zip(weights, biases)):
        din, dout = w.shape
        p = p.at[row_offsets[i]:row_offsets[i] + din, :dout].set(
            w.astype(jnp.float32))
        p = p.at[bias_row0 + i, :dout].set(b.astype(jnp.float32))

    return p, tuple(row_offsets), bias_row0, first_din


def _dynenc_kernel(x_ref, p_ref, o_ref, *, row_offsets, bias_row0, first_din,
                   latent_dim):
    """Fused MLP: relu hidden layers, tanh output layer.

    p_ref is the packed parameter block (VMEM-resident, constant index_map).
    Activations stay at (tm, 128); only the final pre-activation is sliced to
    latent_dim, then tanh'd and stored narrow.
    """
    n_layers = len(row_offsets)
    h = x_ref[...].astype(jnp.float32)                    # (TM, first_din)
    for i, r in enumerate(row_offsets):
        din = first_din if i == 0 else _LANES
        w = p_ref[r:r + din, :]                           # (din, 128) aligned
        b = p_ref[bias_row0 + i:bias_row0 + i + 1, :]     # (1, 128)
        z = jnp.dot(h, w, preferred_element_type=jnp.float32) + b
        if i == n_layers - 1:
            # tanh only on the lanes we keep; store narrow (latent_dim lanes).
            o_ref[...] = jnp.tanh(z[:, :latent_dim]).astype(o_ref.dtype)
        else:
            h = jnp.maximum(z, 0.0)


def _choose_tiling(B, block_batch):
    """Pick (tm, bp): near-balanced sublane-aligned tiles, >=2 grid steps when
    B >= 16 (keeps both v7x TensorCores busy), minimal batch padding."""
    n_tiles = max(pl.cdiv(B, block_batch), 1)
    if B >= 2 * _SUBLANES:
        n_tiles = max(n_tiles, 2)
    tm = _round_up(pl.cdiv(B, n_tiles), _SUBLANES)
    bp = _round_up(B, tm)
    return tm, bp


def dynamics_encoder_forward(x, packed_params, *, row_offsets, bias_row0,
                             first_din, latent_dim, block_batch=2048):
    """y = tanh(relu(...relu(x @ W_in + b_in)...) @ W_out + b_out) in Pallas."""
    B, param_dim = x.shape
    assert param_dim <= first_din

    tm, bp = _choose_tiling(B, block_batch)
    x_p = x
    if bp != B or first_din != param_dim:
        x_p = jnp.pad(x, ((0, bp - B), (0, first_din - param_dim)))

    n_rows = packed_params.shape[0]
    n_layers = len(row_offsets)
    kernel = functools.partial(_dynenc_kernel, row_offsets=row_offsets,
                               bias_row0=bias_row0, first_din=first_din,
                               latent_dim=latent_dim)

    itemsize = jnp.dtype(x.dtype).itemsize
    flops = 2 * bp * _LANES * (first_din + _LANES * (n_layers - 1))
    bytes_accessed = (x_p.size * itemsize                 # x read
                      + packed_params.size * 4            # params, loaded once
                      + bp * latent_dim * itemsize)       # narrow output write

    out = pl.pallas_call(
        kernel,
        out_shape=jax.ShapeDtypeStruct((bp, latent_dim), x.dtype),
        grid=(bp // tm,),
        in_specs=[
            pl.BlockSpec((tm, first_din), lambda i: (i, 0)),   # streams over B
            pl.BlockSpec((n_rows, _LANES), lambda i: (0, 0)),  # VMEM-resident
        ],
        out_specs=pl.BlockSpec((tm, latent_dim), lambda i: (i, 0)),
        compiler_params=pltpu.CompilerParams(
            dimension_semantics=("parallel",)),
        cost_estimate=pl.CostEstimate(
            flops=flops,
            transcendentals=bp * latent_dim,
            bytes_accessed=bytes_accessed),
    )(x_p, packed_params)

    return out[:B, :]


def reference_forward(x, weights, biases):
    h = x
    for i, (w, b) in enumerate(zip(weights, biases)):
        h = jnp.dot(h, w, precision=jax.lax.Precision.HIGHEST,
                    preferred_element_type=jnp.float32) + b
        h = jnp.tanh(h) if i == len(weights) - 1 else jnp.maximum(h, 0.0)
    return h


if __name__ == "__main__":
    # Small shapes consistent with the module defaults:
    # param_dim=8, latent_dim=4, hidden_dim=32, num_hidden_layers=2, batch=2.
    param_dim, latent_dim, hidden_dim, num_hidden_layers = 8, 4, 32, 2
    batch = 2

    key = jax.random.PRNGKey(0)
    n_layers = num_hidden_layers + 2
    keys = jax.random.split(key, 2 * n_layers + 2)

    dims = [param_dim] + [hidden_dim] * (num_hidden_layers + 1) + [latent_dim]
    weights, biases = [], []
    ki = 0
    for din, dout in zip(dims[:-1], dims[1:]):
        weights.append(jax.random.normal(keys[ki], (din, dout), jnp.float32)
                       / jnp.sqrt(jnp.float32(din)))
        ki += 1
        biases.append(jax.random.normal(keys[ki], (dout,), jnp.float32) * 0.1)
        ki += 1
    x = jax.random.normal(keys[ki], (batch, param_dim), jnp.float32)
    ki += 1

    packed, row_offsets, bias_row0, first_din = pack_dynamics_encoder_params(
        weights, biases)

    # Small-batch check (single grid step).
    y = dynamics_encoder_forward(x, packed, row_offsets=row_offsets,
                                 bias_row0=bias_row0, first_din=first_din,
                                 latent_dim=latent_dim)
    jax.block_until_ready(y)
    y_ref = reference_forward(x, weights, biases)
    assert y.shape == (batch, latent_dim)
    assert jnp.allclose(y, y_ref, atol=1e-4, rtol=1e-4), "mismatch (small B)"

    # Larger batch exercises the multi-tile / >=2-grid-step (megacore) path.
    x_big = jax.random.normal(keys[ki], (300, param_dim), jnp.float32)
    y_big = dynamics_encoder_forward(x_big, packed, row_offsets=row_offsets,
                                     bias_row0=bias_row0, first_din=first_din,
                                     latent_dim=latent_dim)
    jax.block_until_ready(y_big)
    y_big_ref = reference_forward(x_big, weights, biases)
    assert y_big.shape == (300, latent_dim)
    assert jnp.allclose(y_big, y_big_ref, atol=1e-4, rtol=1e-4), \
        "mismatch (large B)"

    # TODO(synk): torch.optim.Adam state / training step is not part of the
    # forward pass and is intentionally not implemented.
    print("KERNEL_OK")
</pallas_src>

<mosaic_0001>
module attributes {stable_mosaic.version = 11 : i64} {
  func.func @_dynenc_kernel(%arg0: i32, %arg1: memref<8x8xf32, #tpu.memory_space<vmem>>, %arg2: memref<400x128xf32, #tpu.memory_space<vmem>>, %arg3: memref<8x4xf32, #tpu.memory_space<vmem>>) attributes {dimension_semantics = [#tpu.dimension_semantics<parallel>], iteration_bounds = array<i64: 1>, scalar_prefetch = 0 : i64, scratch_operands = 0 : i64, tpu.core_type = #tpu.core_type<tc>, window_params = [{transform_indices = @transform_0, window_bounds = array<i64: 8, 8>}, {pipeline_mode = #tpu.pipeline_mode<synchronous>, transform_indices = @transform_1, window_bounds = array<i64: 400, 128>}, {transform_indices = @transform_2, window_bounds = array<i64: 8, 4>}]} {
    %c0 = arith.constant 0 : index
    %c0_0 = arith.constant 0 : index
    %0 = vector.load %arg1[%c0, %c0_0] : memref<8x8xf32, #tpu.memory_space<vmem>>, vector<8x8xf32>
    %c0_1 = arith.constant 0 : index
    %c0_2 = arith.constant 0 : index
    %1 = vector.load %arg2[%c0_1, %c0_2] : memref<400x128xf32, #tpu.memory_space<vmem>>, vector<8x128xf32>
    %c392 = arith.constant 392 : index
    %c0_3 = arith.constant 0 : index
    %2 = vector.load %arg2[%c392, %c0_3] : memref<400x128xf32, #tpu.memory_space<vmem>>, vector<1x128xf32>
    %cst = arith.constant dense<0.000000e+00> : vector<8x128xf32>
    %3 = tpu.matmul %0, %1, %cst {dimension_numbers = #tpu.dot_dimension_numbers<[1], [0], [0], [1], [0, 0, 1, 1], [], []>} : vector<8x8xf32>, vector<8x128xf32>, vector<8x128xf32> -> vector<8x128xf32>
    %4 = vector.broadcast %2 : vector<1x128xf32> to vector<8x128xf32>
    %5 = arith.addf %3, %4 : vector<8x128xf32>
    %cst_4 = arith.constant 0.000000e+00 : f32
    %6 = vector.broadcast %cst_4 : f32 to vector<8x128xf32>
    %7 = arith.maximumf %5, %6 : vector<8x128xf32>
    %c8 = arith.constant 8 : index
    %c0_5 = arith.constant 0 : index
    %8 = vector.load %arg2[%c8, %c0_5] : memref<400x128xf32, #tpu.memory_space<vmem>>, vector<128x128xf32>
    %c393 = arith.constant 393 : index
    %c0_6 = arith.constant 0 : index
    %9 = vector.load %arg2[%c393, %c0_6] : memref<400x128xf32, #tpu.memory_space<vmem>>, vector<1x128xf32>
    %cst_7 = arith.constant dense<0.000000e+00> : vector<8x128xf32>
    %10 = tpu.matmul %7, %8, %cst_7 {dimension_numbers = #tpu.dot_dimension_numbers<[1], [0], [0], [1], [0, 0, 1, 1], [], []>} : vector<8x128xf32>, vector<128x128xf32>, vector<8x128xf32> -> vector<8x128xf32>
    %11 = vector.broadcast %9 : vector<1x128xf32> to vector<8x128xf32>
    %12 = arith.addf %10, %11 : vector<8x128xf32>
    %cst_8 = arith.constant 0.000000e+00 : f32
    %13 = vector.broadcast %cst_8 : f32 to vector<8x128xf32>
    %14 = arith.maximumf %12, %13 : vector<8x128xf32>
    %c136 = arith.constant 136 : index
    %c0_9 = arith.constant 0 : index
    %15 = vector.load %arg2[%c136, %c0_9] : memref<400x128xf32, #tpu.memory_space<vmem>>, vector<128x128xf32>
    %c394 = arith.constant 394 : index
    %c0_10 = arith.constant 0 : index
    %16 = vector.load %arg2[%c394, %c0_10] : memref<400x128xf32, #tpu.memory_space<vmem>>, vector<1x128xf32>
    %cst_11 = arith.constant dense<0.000000e+00> : vector<8x128xf32>
    %17 = tpu.matmul %14, %15, %cst_11 {dimension_numbers = #tpu.dot_dimension_numbers<[1], [0], [0], [1], [0, 0, 1, 1], [], []>} : vector<8x128xf32>, vector<128x128xf32>, vector<8x128xf32> -> vector<8x128xf32>
    %18 = vector.broadcast %16 : vector<1x128xf32> to vector<8x128xf32>
    %19 = arith.addf %17, %18 : vector<8x128xf32>
    %cst_12 = arith.constant 0.000000e+00 : f32
    %20 = vector.broadcast %cst_12 : f32 to vector<8x128xf32>
    %21 = arith.maximumf %19, %20 : vector<8x128xf32>
    %c264 = arith.constant 264 : index
    %c0_13 = arith.constant 0 : index
    %22 = vector.load %arg2[%c264, %c0_13] : memref<400x128xf32, #tpu.memory_space<vmem>>, vector<128x128xf32>
    %c395 = arith.constant 395 : index
    %c0_14 = arith.constant 0 : index
    %23 = vector.load %arg2[%c395, %c0_14] : memref<400x128xf32, #tpu.memory_space<vmem>>, vector<1x128xf32>
    %cst_15 = arith.constant dense<0.000000e+00> : vector<8x128xf32>
    %24 = tpu.matmul %21, %22, %cst_15 {dimension_numbers = #tpu.dot_dimension_numbers<[1], [0], [0], [1], [0, 0, 1, 1], [], []>} : vector<8x128xf32>, vector<128x128xf32>, vector<8x128xf32> -> vector<8x128xf32>
    %25 = vector.broadcast %23 : vector<1x128xf32> to vector<8x128xf32>
    %26 = arith.addf %24, %25 : vector<8x128xf32>
    %27 = vector.extract_strided_slice %26 {offsets = [0, 0], sizes = [8, 4], strides = [1, 1]} : vector<8x128xf32> to vector<8x4xf32>
    %28 = math.tanh %27 : vector<8x4xf32>
    %c0_16 = arith.constant 0 : index
    %c0_17 = arith.constant 0 : index
    %29 = vector.load %arg3[%c0_16, %c0_17] : memref<8x4xf32, #tpu.memory_space<vmem>>, vector<8x4xf32>
    tpu.vector_store %arg3[%c0_16, %c0_17], %28 {strides = array<i32>} : memref<8x4xf32, #tpu.memory_space<vmem>>, vector<8x4xf32>,
    return
  }
  func.func @transform_0(%arg0: i32) -> (i32, i32) {
    %c0_i32 = arith.constant 0 : i32
    %c0_i32_0 = arith.constant 0 : i32
    return %arg0, %c0_i32 : i32, i32
  }
  func.func @transform_1(%arg0: i32) -> (i32, i32) {
    %c0_i32 = arith.constant 0 : i32
    %c0_i32_0 = arith.constant 0 : i32
    %c0_i32_1 = arith.constant 0 : i32
    return %c0_i32, %c0_i32_0 : i32, i32
  }
  func.func @transform_2(%arg0: i32) -> (i32, i32) {
    %c0_i32 = arith.constant 0 : i32
    %c0_i32_0 = arith.constant 0 : i32
    return %arg0, %c0_i32 : i32, i32
  }
}

</mosaic_0001>

<bundles_post_ra>
// kernel: tpu_custom_call.1
= control target key start
LH: loop header
LB: loop body
LE: loop exit
PB: predicated region body
PF: predicated region fallthrough
CT: control target
= control target key end

     0   :  { %7 = vsyncpa [#allocation3], 0  ;;  %s789_s0 = inlined_call_operand.hbm [shape: f32[8,8], index: 0, kind: input, shape index: {}]   ;;  %s790_s1 = inlined_call_operand.hbm [shape: f32[400,128], index: 1, kind: input, shape index: {}]   ;;  %s791_s2 = inlined_call_operand.vmem [shape: f32[8,4], index: 2, kind: output, shape index: {}]  }
   0x1   :  { %8 = vsyncpa [#allocation5], 0  ;;  %s700_s9 = smov [#allocation2]   ;;  %s701_s11 = smov [#allocation4]  }
   0x2   :  { %s15_s10 = sshll.u32 %s700_s9, 4  ;;  %s24_s12 = sshll.u32 %s701_s11, 4  ;;  %s16_s10 = int_to_ptr.vmem [resolvable:$true] %s15_s10  ;;  %s722_s12 = int_to_ptr.vmem [resolvable:$true] %s24_s12 }
   0x3   :  { %s652_s15 = scalar_lea.hbm %s789_s0, 128 }
   0x4   :  { %p653_p0 = scmp.ne.s32.totalorder %s789_s0, %s652_s15  ;;  %p656_p1 = scmp.lt.u32.totalorder %s652_s15, %s789_s0 }
   0x6   :  { %p658_p2 = pnand %p656_p1, %p653_p0 }
   0x8   :  { %661 = shalt.err (!%p658_p2)
}
   0x9   :  { %s662_s20 = scalar_lea.vmem %s16_s10, 128  ;;  %p667_p4 = scmp.lt.s32.totalorder %s16_s10, %s16_s10 }
   0xa   :  { %p663_p3 = scmp.ne.s32.totalorder %s16_s10, %s662_s20  ;;  %p668_p5 = scmp.lt.s32.totalorder %s662_s20, %s662_s20 }
   0xc   :  { %p669_p6 = por %p668_p5, %p667_p4 }
   0xe   :  { %p670_p7 = pnand %p669_p6, %p663_p3 }
  0x10   :  { %673 = shalt.err (!%p670_p7)
}
  0x11   :  { %18 = dma.hbm_to_vmem [thread:$0]  %s789_s0, 128, %s16_s10, [#allocation3]  }
  0x12   :  { %s674_s25 = scalar_lea.hbm %s790_s1, 6400 }
  0x13   :  { %p675_p8 = scmp.ne.s32.totalorder %s790_s1, %s674_s25  ;;  %p678_p9 = scmp.lt.u32.totalorder %s674_s25, %s790_s1 }
  0x15   :  { %p680_p10 = pnand %p678_p9, %p675_p8 }
  0x17   :  { %683 = shalt.err (!%p680_p10)
}
  0x18   :  { %s684_s30 = scalar_lea.vmem %s722_s12, 6400  ;;  %p689_p12 = scmp.lt.s32.totalorder %s722_s12, %s722_s12 }
  0x19   :  { %p685_p11 = scmp.ne.s32.totalorder %s722_s12, %s684_s30  ;;  %p690_p13 = scmp.lt.s32.totalorder %s684_s30, %s684_s30 }
  0x1b   :  { %p691_p0 = por %p690_p13, %p689_p12 }
  0x1d   :  { %p692_p1 = pnand %p691_p0, %p685_p11 }
  0x1f   :  { %695 = shalt.err (!%p692_p1)
}
  0x20   :  { %s702_s0 = smov 128   ;;  %s703_s3 = smov 8  }
  0x21   :  { %30 = dma.hbm_to_vmem [thread:$0]  %s790_s1, 6400, %s722_s12, [#allocation5], %s702_s0, %s702_s0, %s703_s3  }
  0x22   :  { %696 = dma.done.wait [#allocation3], 128  }
  0x23   :  { %697 = vsyncadd [#allocation3], 4294967168 }
  0x24   :  { %698 = dma.done.wait [#allocation5], 6400  }
  0x25   :  { %699 = vsyncadd [#allocation5], 4294960896  ;;  %v704_v0 = vmov 0.0   ;;  %vm705_vm0 = vmmov 0   ;;  %v706_v1 = vmov 0.0|0.0   ;;  %vm44_vm1 = vcmask 64512  }
  0x26   :  { %461 = vmatprep.subr.mxu0 %v704_v0  ;;  %463 = vmatprep.mubr.msk.f32.mxu0 %vm705_vm0, %v704_v0  ;;  %v38_v2 = vld [vmem:[#allocation4] sm:$0xff]  ;;  %v37_v3 = vld [vmem:[#allocation2] sm:$0xff]  ;;  %v119_v4 = vld [vmem:[#allocation4 + $0x8] sm:$0xff]  ;;  %vm395_vm2 = vcmask 31744  }
  0x27   :  { %571 = vmatprep.subr.bf16.mxu1 %v706_v1  ;;  %498 = vmatprep.mubr.msk.f32.mxu1 %vm705_vm0, %v704_v0  ;;  %v120_v5 = vld [vmem:[#allocation4 + $0x10] sm:$0xff]  ;;  %v121_v6 = vld [vmem:[#allocation4 + $0x18] sm:$0xff]  ;;  %v122_v7 = vld [vmem:[#allocation4 + $0x20] sm:$0xff] }
  0x28   :  { %462 = vmatpush3.msra.mxu0 %v38_v2  ;;  %v572_v8 = vpack.c.bf16 %v120_v5, %v119_v4  ;;  %v575_v9 = vpack.c.bf16 %v122_v7, %v121_v6  ;;  %v123_v10 = vld [vmem:[#allocation4 + $0x28] sm:$0xff]  ;;  %v124_v11 = vld [vmem:[#allocation4 + $0x30] sm:$0xff]  ;;  %v125_v13 = vld [vmem:[#allocation4 + $0x38] sm:$0xff] }
  0x29   :  { %464 = vmatmul.mubr.msk.f32.vlgmr.msra.gmra.mrb[0].mxu0 %vm44_vm1, %v37_v3  ;;  %595 = vmatprep.subr.bf16.mxu0 %v706_v1  ;;  %v578_v12 = vpack.c.bf16 %v124_v11, %v123_v10  ;;  %v126_v14 = vld [vmem:[#allocation4 + $0x40] sm:$0xff]  ;;  %v127_v16 = vld [vmem:[#allocation4 + $0x48] sm:$0xff]  ;;  %v128_v17 = vld [vmem:[#allocation4 + $0x50] sm:$0xff] }
  0x2a   :  { %533 = vmatprep.mubr.msk.f32.mxu0 %vm705_vm0, %v704_v0  ;;  %573 = vmatpush3.bf16.msra.mxu1 %v572_v8  ;;  %v581_v15 = vpack.c.bf16 %v126_v14, %v125_v13  ;;  %v584_v18 = vpack.c.bf16 %v128_v17, %v127_v16  ;;  %v129_v19 = vld [vmem:[#allocation4 + $0x58] sm:$0xff]  ;;  %v130_v20 = vld [vmem:[#allocation4 + $0x60] sm:$0xff]  ;;  %v131_v22 = vld [vmem:[#allocation4 + $0x68] sm:$0xff] }
  0x2b   :  { %574 = vmatprep.subr.bf16.mxu1 %v706_v1  ;;  %v587_v21 = vpack.c.bf16 %v130_v20, %v129_v19  ;;  %v132_v23 = vld [vmem:[#allocation4 + $0x70] sm:$0xff]  ;;  %v133_v25 = vld [vmem:[#allocation4 + $0x78] sm:$0xff]  ;;  %v134_v26 = vld [vmem:[#allocation4 + $0x80] sm:$0xff] }
  0x2c   :  { %v590_v24 = vpack.c.bf16 %v132_v23, %v131_v22  ;;  %v593_v27 = vpack.c.bf16 %v134_v26, %v133_v25  ;;  %v211_v28 = vld [vmem:[#allocation4 + $0x88] sm:$0xff]  ;;  %v212_v29 = vld [vmem:[#allocation4 + $0x90] sm:$0xff]  ;;  %v213_v30 = vld [vmem:[#allocation4 + $0x98] sm:$0xff] }
  0x2d   :  { %v596_v31 = vpack.c.bf16 %v212_v29, %v211_v28  ;;  %v214_v32 = vld [vmem:[#allocation4 + $0xa0] sm:$0xff]  ;;  %v215_v34 = vld [vmem:[#allocation4 + $0xa8] sm:$0xff]  ;;  %v216_v35 = vld [vmem:[#allocation4 + $0xb0] sm:$0xff] }
  0x2e   :  { %576 = vmatpush3.bf16.msra.mxu1 %v575_v9  ;;  %v599_v33 = vpack.c.bf16 %v214_v32, %v213_v30  ;;  %v602_v36 = vpack.c.bf16 %v216_v35, %v215_v34  ;;  %v217_v37 = vld [vmem:[#allocation4 + $0xb8] sm:$0xff]  ;;  %v218_v38 = vld [vmem:[#allocation4 + $0xc0] sm:$0xff]  ;;  %v219_v40 = vld [vmem:[#allocation4 + $0xc8] sm:$0xff] }
  0x2f   :  { %577 = vmatprep.subr.bf16.mxu1 %v706_v1  ;;  %597 = vmatpush3.bf16.msra.mxu0 %v596_v31  ;;  %v605_v39 = vpack.c.bf16 %v218_v38, %v217_v37  ;;  %v220_v41 = vld [vmem:[#allocation4 + $0xd0] sm:$0xff]  ;;  %v221_v43 = vld [vmem:[#allocation4 + $0xd8] sm:$0xff]  ;;  %v222_v44 = vld [vmem:[#allocation4 + $0xe0] sm:$0xff] }
  0x30   :  { %598 = vmatprep.subr.bf16.mxu0 %v706_v1  ;;  %v608_v42 = vpack.c.bf16 %v220_v41, %v219_v40  ;;  %v611_v45 = vpack.c.bf16 %v222_v44, %v221_v43  ;;  %v223_v46 = vld [vmem:[#allocation4 + $0xe8] sm:$0xff]  ;;  %v224_v47 = vld [vmem:[#allocation4 + $0xf0] sm:$0xff]  ;;  %v225_v54 = vld [vmem:[#allocation4 + $0xf8] sm:$0xff] }
  0x31   :  { %v614_v48 = vpack.c.bf16 %v224_v47, %v223_v46  ;;  %v403_v49 = vld [vmem:[#allocation4 + $0x188] ss:$0 sm:$0xff]  ;;  %v226_v55 = vld [vmem:[#allocation4 + $0x100] sm:$0xff]  ;;  %v304_v58 = vld [vmem:[#allocation4 + $0x110] sm:$0xff] }
  0x32   :  { %579 = vmatpush3.bf16.msra.mxu1 %v578_v12  ;;  %v617_v56 = vpack.c.bf16 %v226_v55, %v225_v54  ;;  %v303_v57 = vld [vmem:[#allocation4 + $0x108] sm:$0xff]  ;;  %v305_v59 = vld [vmem:[#allocation4 + $0x118] sm:$0xff]  ;;  %v306_v61 = vld [vmem:[#allocation4 + $0x120] sm:$0xff] }
  0x33   :  { %580 = vmatprep.subr.bf16.mxu1 %v706_v1  ;;  %600 = vmatpush3.bf16.msra.mxu0 %v599_v33  ;;  %v620_v60 = vpack.c.bf16 %v304_v58, %v303_v57  ;;  %v623_v62 = vpack.c.bf16 %v306_v61, %v305_v59  ;;  %v307_v63 = vld [vmem:[#allocation4 + $0x128] sm:$0xff]  ;;  %v308_v2 = vld [vmem:[#allocation4 + $0x130] sm:$0xff]  ;;  %v310_v4 = vld [vmem:[#allocation4 + $0x140] sm:$0xff] }
  0x34   :  { %601 = vmatprep.subr.bf16.mxu0 %v706_v1  ;;  %v626_v3 = vpack.c.bf16 %v308_v2, %v307_v63  ;;  %v311_v6 = vld [vmem:[#allocation4 + $0x148] sm:$0xff]  ;;  %v312_v7 = vld [vmem:[#allocation4 + $0x150] sm:$0xff]  ;;  %v313_v9 = vld [vmem:[#allocation4 + $0x158] sm:$0xff] }
  0x35   :  { %v632_v8 = vpack.c.bf16 %v312_v7, %v311_v6  ;;  %v314_v10 = vld [vmem:[#allocation4 + $0x160] sm:$0xff]  ;;  %v315_v12 = vld [vmem:[#allocation4 + $0x168] sm:$0xff]  ;;  %v316_v13 = vld [vmem:[#allocation4 + $0x170] sm:$0xff] }
  0x36   :  { %582 = vmatpush3.bf16.msra.mxu1 %v581_v15  ;;  %v635_v11 = vpack.c.bf16 %v314_v10, %v313_v9  ;;  %v638_v14 = vpack.c.bf16 %v316_v13, %v315_v12  ;;  %v405_v15 = vld [vmem:[#allocation4 + $0x189] ss:$0 sm:$0xff]  ;;  %v317_v20 = vld [vmem:[#allocation4 + $0x178] sm:$0xff]  ;;  %v406_v23 = vld [vmem:[#allocation4 + $0x18a] ss:$0 sm:$0xff] }
  0x37   :  { %583 = vmatprep.subr.bf16.mxu1 %v706_v1  ;;  %603 = vmatpush3.bf16.msra.mxu0 %v602_v36  ;;  %v407_v28 = vld [vmem:[#allocation4 + $0x18b] ss:$0 sm:$0xff] }
  0x38   :  { %604 = vmatprep.subr.bf16.mxu0 %v706_v1 }
  0x3a   :  { %585 = vmatpush3.bf16.msra.mxu1 %v584_v18 }
  0x3b   :  { %586 = vmatprep.subr.bf16.mxu1 %v706_v1  ;;  %606 = vmatpush3.bf16.msra.mxu0 %v605_v39 }
  0x3c   :  { %607 = vmatprep.subr.bf16.mxu0 %v706_v1 }
  0x3e   :  { %588 = vmatpush3.bf16.msra.mxu1 %v587_v21  ;;  %v318_v21 = vld [vmem:[#allocation4 + $0x180] sm:$0xff] }
  0x3f   :  { %589 = vmatprep.subr.bf16.mxu1 %v706_v1  ;;  %609 = vmatpush3.bf16.msra.mxu0 %v608_v42  ;;  %v641_v22 = vpack.c.bf16 %v318_v21, %v317_v20 }
  0x40   :  { %610 = vmatprep.subr.bf16.mxu0 %v706_v1 }
  0x42   :  { %591 = vmatpush3.bf16.msra.mxu1 %v590_v24 }
  0x43   :  { %592 = vmatprep.subr.bf16.mxu1 %v706_v1  ;;  %612 = vmatpush3.bf16.msra.mxu0 %v611_v45 }
  0x44   :  { %613 = vmatprep.subr.bf16.mxu0 %v706_v1 }
  0x46   :  { %594 = vmatpush3.bf16.msra.mxu1 %v593_v27 }
  0x47   :  { %619 = vmatprep.subr.bf16.mxu1 %v706_v1  ;;  %615 = vmatpush3.bf16.msra.mxu0 %v614_v48 }
  0x48   :  { %616 = vmatprep.subr.bf16.mxu0 %v706_v1 }
  0x4b   :  { %618 = vmatpush3.bf16.msra.mxu0 %v617_v56 }
  0xfc   :  { %v114_v50 = vpop.f32.mrb[0].mxu0 }
  0xfd   :  { %v115_v51 = vadd.f32 %v403_v49, %v114_v50  ;;  %v465_v52 = vpop.f32.mrb[1].mxu0 }
  0xff   :  { %v118_v53 = vmax.f32 %v115_v51, 0.0 }
 0x101   :  { %499 = vmatmul.mubr.f32.vlgmr.msra.gmra.mrb[0].mxu1 %v118_v53 }
 0x102   :  { %568 = vmatprep.mubr.msk.f32.mxu1 %vm705_vm0, %v704_v0  ;;  %621 = vmatpush3.bf16.msra.mxu1 %v620_v60  ;;  %v309_v0 = vld [vmem:[#allocation4 + $0x138] sm:$0xff] }
 0x103   :  { %622 = vmatprep.subr.bf16.mxu1 %v706_v1  ;;  %v629_v5 = vpack.c.bf16 %v310_v4, %v309_v0 }
 0x106   :  { %624 = vmatpush3.bf16.msra.mxu1 %v623_v62 }
 0x107   :  { %625 = vmatprep.subr.bf16.mxu1 %v706_v1 }
 0x10a   :  { %627 = vmatpush3.bf16.msra.mxu1 %v626_v3 }
 0x10b   :  { %628 = vmatprep.subr.bf16.mxu1 %v706_v1 }
 0x10e   :  { %630 = vmatpush3.bf16.msra.mxu1 %v629_v5 }
 0x10f   :  { %631 = vmatprep.subr.bf16.mxu1 %v706_v1 }
 0x112   :  { %633 = vmatpush3.bf16.msra.mxu1 %v632_v8 }
 0x113   :  { %634 = vmatprep.subr.bf16.mxu1 %v706_v1 }
 0x116   :  { %636 = vmatpush3.bf16.msra.mxu1 %v635_v11 }
 0x117   :  { %637 = vmatprep.subr.bf16.mxu1 %v706_v1 }
 0x11a   :  { %639 = vmatpush3.bf16.msra.mxu1 %v638_v14 }
 0x11b   :  { %640 = vmatprep.subr.bf16.mxu1 %v706_v1 }
 0x11e   :  { %642 = vmatpush3.bf16.msra.mxu1 %v641_v22 }
 0x1d4   :  { %v206_v16 = vpop.f32.mrb[0].mxu1 }
 0x1d5   :  { %v207_v17 = vadd.f32 %v405_v15, %v206_v16  ;;  %v500_v18 = vpop.f32.mrb[1].mxu1 }
 0x1d7   :  { %v210_v19 = vmax.f32 %v207_v17, 0.0 }
 0x1d9   :  { %534 = vmatmul.mubr.f32.vlgmr.msra.gmra.mrb[2].mxu0 %v210_v19 }
 0x2ac   :  { %v298_v24 = vpop.f32.mrb[2].mxu0 }
 0x2ad   :  { %v299_v25 = vadd.f32 %v406_v23, %v298_v24  ;;  %v535_v26 = vpop.f32.mrb[3].mxu0 }
 0x2af   :  { %v302_v27 = vmax.f32 %v299_v25, 0.0 }
 0x2b1   :  { %569 = vmatmul.mubr.f32.vlgmr.msra.gmra.mrb[2].mxu1 %v302_v27 }
 0x384   :  { %v390_v29 = vpop.f32.mrb[2].mxu1 }
 0x385   :  { %v391_v30 = vadd.f32 %v407_v28, %v390_v29  ;;  %v570_v1 = vpop.f32.mrb[3].mxu1 }
 0x387   :  { %650 = vtanh.f32 %v391_v30 }
 0x391   :  { %v651_v31 = vpop.eup %650 }
 0x392   :  { %396 = vst.msk [vmem:[%s791_s2] sm:$0xff] %vm395_vm2, %v651_v31 }
 0x393   :  { %401 = vsyncpa [#allocation3], 1 }
 0x394   :  { %402 = vsyncpa [#allocation5], 1 }

</bundles_post_ra>
